<compile_context>
chip_gen: v5e
topology: v5e:2x2
jax: 0.10.0
libtpu: 0.0.40
codegen_flags: <defaults>
</compile_context>

<pallas_src>
import functools

import jax
import jax.numpy as jnp
from jax.experimental import pallas as pl
from jax.experimental.pallas import tpu as pltpu


def _round_up(n, m):
    return ((n + m - 1) // m) * m


def mlp_kernel(x_ref, w1_ref, b1_ref, w2_ref, b2_ref, w3_ref, b3_ref, out_ref,
               *, out_size):
    # x should already arrive as bf16 (producer-side); only cast if it didn't.
    x = x_ref[...]
    if x.dtype != jnp.bfloat16:
        x = x.astype(jnp.bfloat16)

    # layer1 + ReLU (MXU dot, f32 accumulation, f32 elementwise).
    h1 = jnp.dot(x, w1_ref[...], preferred_element_type=jnp.float32) + b1_ref[...]
    h1 = jnp.maximum(h1, 0.0)

    # layer2 + ReLU (lane-dense padded width; pad cols are exact zeros).
    h2 = jnp.dot(h1.astype(jnp.bfloat16), w2_ref[...],
                 preferred_element_type=jnp.float32) + b2_ref[...]
    h2 = jnp.maximum(h2, 0.0)

    # layer3 -> (TB, out_pad) lane-dense logits.
    logits = jnp.dot(h2.astype(jnp.bfloat16), w3_ref[...],
                     preferred_element_type=jnp.float32) + b3_ref[...]

    # Softmax over the real output columns only (padded lanes masked to -inf).
    col = jax.lax.broadcasted_iota(jnp.int32, logits.shape, 1)
    logits = jnp.where(col < out_size, logits, -jnp.inf)
    m = jnp.max(logits, axis=-1, keepdims=True)
    e = jnp.exp(logits - m)                        # padded lanes -> exp(-inf) = 0
    denom = jnp.sum(e, axis=-1, keepdims=True)
    # Exact divide: rows sum to 1 to f32 rounding; VPU has slack (DMA-bound).
    out_ref[...] = (e / denom).astype(out_ref.dtype)


def prepare_params(params, compute_dtype=jnp.bfloat16):
    """One-time prep: transpose PyTorch (out,in)->(in,out), cast weights to
    bf16, pad to lane-dense 128-wide tiles.  Biases stay f32 (VPU path)."""
    w1 = params["w1"].T    # (in, h1)
    w2 = params["w2"].T    # (h1, h2)
    w3 = params["w3"].T    # (h2, out)
    in_size, h1 = w1.shape
    _, h2 = w2.shape
    _, out_size = w3.shape

    h1_pad = _round_up(h1, 128)
    h2_pad = _round_up(h2, 128)
    out_pad = _round_up(out_size, 128)

    w1p = jnp.pad(w1, ((0, 0), (0, h1_pad - h1))).astype(compute_dtype)
    b1p = jnp.pad(params["b1"], (0, h1_pad - h1))[None, :].astype(jnp.float32)

    w2p = jnp.pad(w2, ((0, h1_pad - h1), (0, h2_pad - h2))).astype(compute_dtype)
    b2p = jnp.pad(params["b2"], (0, h2_pad - h2))[None, :].astype(jnp.float32)

    w3p = jnp.pad(w3, ((0, h2_pad - h2), (0, out_pad - out_size))).astype(compute_dtype)
    b3p = jnp.pad(params["b3"], (0, out_pad - out_size))[None, :].astype(jnp.float32)

    return {
        "w1": w1p, "b1": b1p, "w2": w2p, "b2": b2p, "w3": w3p, "b3": b3p,
        "in_size": in_size, "out_size": out_size,
        "h1_pad": h1_pad, "h2_pad": h2_pad, "out_pad": out_pad,
    }


def neural_net_forward(x, prepared, *, block_batch=1024, min_grid_steps=1,
                       out_dtype=jnp.float32):
    """x: (B, input_size), ideally bf16 (halves the dominant HBM stream).
    prepared: output of prepare_params().  Returns (B, output_size) out_dtype.
    min_grid_steps=2 is recommended on v7x so both TensorCores get a tile."""
    B, in_size = x.shape
    assert in_size == prepared["in_size"]
    out_size = prepared["out_size"]
    h1_pad, h2_pad, out_pad = prepared["h1_pad"], prepared["h2_pad"], prepared["out_pad"]

    # Batch tile: multiple of 8 (sublane); big tiles amortize the ~0.35us/step
    # grid cost.  NO wrapper-side padding of x: the ragged last block is
    # handled by Pallas (writeback masked), avoiding an extra HBM pass over x.
    TB = min(block_batch, _round_up(B, 8))
    if min_grid_steps > 1:
        TB = min(TB, _round_up(pl.cdiv(B, min_grid_steps), 8))
    TB = max(TB, 8)
    grid = (pl.cdiv(B, TB),)

    # Scoped-VMEM hint only when the footprint could exceed v5e's 16 MiB
    # default scoped limit (very large TB); otherwise leave the default.
    est_bytes = (2 * TB * in_size * x.dtype.itemsize                    # x (double-buffered)
                 + 2 * TB * out_pad * jnp.dtype(out_dtype).itemsize     # out (double-buffered)
                 + 2 * 2 * (in_size * h1_pad + h1_pad * h2_pad + h2_pad * out_pad)  # bf16 weights
                 + 2 * 4 * (h1_pad + h2_pad + out_pad))                 # f32 biases
    vmem_limit = None
    if est_bytes > 12 * 1024 * 1024:
        vmem_limit = min(2 * est_bytes, 100 * 1024 * 1024)

    kernel = functools.partial(mlp_kernel, out_size=out_size)

    out = pl.pallas_call(
        kernel,
        out_shape=jax.ShapeDtypeStruct((B, out_pad), out_dtype),
        grid=grid,
        in_specs=[
            pl.BlockSpec((TB, in_size), lambda i: (i, 0)),      # x: streamed over batch
            # Weights/biases: constant (0,0) block index -> VMEM-resident
            # across grid steps (no per-step re-DMA on the hot HBM path).
            pl.BlockSpec((in_size, h1_pad), lambda i: (0, 0)),
            pl.BlockSpec((1, h1_pad), lambda i: (0, 0)),
            pl.BlockSpec((h1_pad, h2_pad), lambda i: (0, 0)),
            pl.BlockSpec((1, h2_pad), lambda i: (0, 0)),
            pl.BlockSpec((h2_pad, out_pad), lambda i: (0, 0)),
            pl.BlockSpec((1, out_pad), lambda i: (0, 0)),
        ],
        out_specs=pl.BlockSpec((TB, out_pad), lambda i: (i, 0)),  # lane-dense output
        compiler_params=pltpu.CompilerParams(
            dimension_semantics=("parallel",),
            vmem_limit_bytes=vmem_limit),
    )(x, prepared["w1"], prepared["b1"], prepared["w2"], prepared["b2"],
      prepared["w3"], prepared["b3"])

    # Only the column padding is sliced off (batch was never padded).
    return out[:, :out_size]


def init_params(key, input_size=28 * 28, hidden_size=(128, 64), output_size=10):
    """Deterministic synthetic init (PyTorch Linear weight layout: (out, in))."""
    ks = jax.random.split(key, 6)

    def lin(kw, kb, fan_in, fan_out):
        bound = 1.0 / jnp.sqrt(fan_in)
        w = jax.random.uniform(kw, (fan_out, fan_in), jnp.float32, -bound, bound)
        b = jax.random.uniform(kb, (fan_out,), jnp.float32, -bound, bound)
        return w, b

    w1, b1 = lin(ks[0], ks[1], input_size, hidden_size[0])
    w2, b2 = lin(ks[2], ks[3], hidden_size[0], hidden_size[1])
    w3, b3 = lin(ks[4], ks[5], hidden_size[1], output_size)
    return {"w1": w1, "b1": b1, "w2": w2, "b2": b2, "w3": w3, "b3": b3}


if __name__ == "__main__":
    key = jax.random.PRNGKey(0)
    k_params, k_x = jax.random.split(key)

    input_size = 28 * 28
    hidden_size = (128, 64)
    output_size = 10
    batch = 64

    params = init_params(k_params, input_size, hidden_size, output_size)
    prepared = prepare_params(params)  # one-time transpose / bf16 cast / pad

    x_f32 = jax.random.normal(k_x, (batch, input_size), jnp.float32)
    # Feed x as bf16 (dominant HBM stream halved).  In production the data
    # producer should emit bf16 directly; the cast here is demo-only.
    x = x_f32.astype(jnp.bfloat16)

    out = jax.block_until_ready(neural_net_forward(x, prepared))

    # Pure-JAX f32 reference on the same (bf16-quantized) input; bf16 weights
    # in the kernel -> loosened tolerance.
    xr = x.astype(jnp.float32)
    h1 = jnp.maximum(xr @ params["w1"].T + params["b1"], 0.0)
    h2 = jnp.maximum(h1 @ params["w2"].T + params["b2"], 0.0)
    ref = jax.nn.softmax(h2 @ params["w3"].T + params["b3"], axis=1)

    assert out.shape == (batch, output_size)
    assert jnp.allclose(jnp.sum(out, axis=1), 1.0, atol=1e-3)
    assert jnp.allclose(out, ref, atol=2e-2, rtol=2e-2)

    # Unaligned batch exercises the padding-free ragged block path
    # (grid=cdiv(B,TB); out-of-bounds rows masked on writeback).
    x2 = x_f32[:50].astype(jnp.bfloat16)
    out2 = jax.block_until_ready(neural_net_forward(x2, prepared))
    assert out2.shape == (50, output_size)
    assert jnp.allclose(jnp.sum(out2, axis=1), 1.0, atol=1e-3)
    assert jnp.allclose(out2, ref[:50], atol=2e-2, rtol=2e-2)

    print("KERNEL_OK")
</pallas_src>

<mosaic_0001>
module attributes {stable_mosaic.version = 11 : i64} {
  func.func @mlp_kernel(%arg0: i32, %arg1: memref<64x784xbf16, #tpu.memory_space<vmem>>, %arg2: memref<784x128xbf16, #tpu.memory_space<vmem>>, %arg3: memref<1x128xf32, #tpu.memory_space<vmem>>, %arg4: memref<128x128xbf16, #tpu.memory_space<vmem>>, %arg5: memref<1x128xf32, #tpu.memory_space<vmem>>, %arg6: memref<128x128xbf16, #tpu.memory_space<vmem>>, %arg7: memref<1x128xf32, #tpu.memory_space<vmem>>, %arg8: memref<64x128xf32, #tpu.memory_space<vmem>>) attributes {dimension_semantics = [#tpu.dimension_semantics<parallel>], iteration_bounds = array<i64: 1>, scalar_prefetch = 0 : i64, scratch_operands = 0 : i64, tpu.core_type = #tpu.core_type<tc>, window_params = [{transform_indices = @transform_0, window_bounds = array<i64: 64, 784>}, {pipeline_mode = #tpu.pipeline_mode<synchronous>, transform_indices = @transform_1, window_bounds = array<i64: 784, 128>}, {pipeline_mode = #tpu.pipeline_mode<synchronous>, transform_indices = @transform_2, window_bounds = array<i64: 1, 128>}, {pipeline_mode = #tpu.pipeline_mode<synchronous>, transform_indices = @transform_3, window_bounds = array<i64: 128, 128>}, {pipeline_mode = #tpu.pipeline_mode<synchronous>, transform_indices = @transform_4, window_bounds = array<i64: 1, 128>}, {pipeline_mode = #tpu.pipeline_mode<synchronous>, transform_indices = @transform_5, window_bounds = array<i64: 128, 128>}, {pipeline_mode = #tpu.pipeline_mode<synchronous>, transform_indices = @transform_6, window_bounds = array<i64: 1, 128>}, {transform_indices = @transform_7, window_bounds = array<i64: 64, 128>}]} {
    %c0 = arith.constant 0 : index
    %c0_0 = arith.constant 0 : index
    %0 = vector.load %arg1[%c0, %c0_0] : memref<64x784xbf16, #tpu.memory_space<vmem>>, vector<64x784xbf16>
    %c0_1 = arith.constant 0 : index
    %c0_2 = arith.constant 0 : index
    %1 = vector.load %arg2[%c0_1, %c0_2] : memref<784x128xbf16, #tpu.memory_space<vmem>>, vector<784x128xbf16>
    %cst = arith.constant dense<0.000000e+00> : vector<64x128xf32>
    %2 = tpu.matmul %0, %1, %cst {dimension_numbers = #tpu.dot_dimension_numbers<[1], [0], [0], [1], [0, 0, 1, 1], [], []>} : vector<64x784xbf16>, vector<784x128xbf16>, vector<64x128xf32> -> vector<64x128xf32>
    %c0_3 = arith.constant 0 : index
    %c0_4 = arith.constant 0 : index
    %3 = vector.load %arg3[%c0_3, %c0_4] : memref<1x128xf32, #tpu.memory_space<vmem>>, vector<1x128xf32>
    %4 = vector.broadcast %3 : vector<1x128xf32> to vector<64x128xf32>
    %5 = arith.addf %2, %4 : vector<64x128xf32>
    %cst_5 = arith.constant 0.000000e+00 : f32
    %6 = vector.broadcast %cst_5 : f32 to vector<64x128xf32>
    %7 = arith.maximumf %5, %6 : vector<64x128xf32>
    %8 = arith.truncf %7 : vector<64x128xf32> to vector<64x128xbf16>
    %c0_6 = arith.constant 0 : index
    %c0_7 = arith.constant 0 : index
    %9 = vector.load %arg4[%c0_6, %c0_7] : memref<128x128xbf16, #tpu.memory_space<vmem>>, vector<128x128xbf16>
    %cst_8 = arith.constant dense<0.000000e+00> : vector<64x128xf32>
    %10 = tpu.matmul %8, %9, %cst_8 {dimension_numbers = #tpu.dot_dimension_numbers<[1], [0], [0], [1], [0, 0, 1, 1], [], []>} : vector<64x128xbf16>, vector<128x128xbf16>, vector<64x128xf32> -> vector<64x128xf32>
    %c0_9 = arith.constant 0 : index
    %c0_10 = arith.constant 0 : index
    %11 = vector.load %arg5[%c0_9, %c0_10] : memref<1x128xf32, #tpu.memory_space<vmem>>, vector<1x128xf32>
    %12 = vector.broadcast %11 : vector<1x128xf32> to vector<64x128xf32>
    %13 = arith.addf %10, %12 : vector<64x128xf32>
    %cst_11 = arith.constant 0.000000e+00 : f32
    %14 = vector.broadcast %cst_11 : f32 to vector<64x128xf32>
    %15 = arith.maximumf %13, %14 : vector<64x128xf32>
    %16 = arith.truncf %15 : vector<64x128xf32> to vector<64x128xbf16>
    %c0_12 = arith.constant 0 : index
    %c0_13 = arith.constant 0 : index
    %17 = vector.load %arg6[%c0_12, %c0_13] : memref<128x128xbf16, #tpu.memory_space<vmem>>, vector<128x128xbf16>
    %cst_14 = arith.constant dense<0.000000e+00> : vector<64x128xf32>
    %18 = tpu.matmul %16, %17, %cst_14 {dimension_numbers = #tpu.dot_dimension_numbers<[1], [0], [0], [1], [0, 0, 1, 1], [], []>} : vector<64x128xbf16>, vector<128x128xbf16>, vector<64x128xf32> -> vector<64x128xf32>
    %c0_15 = arith.constant 0 : index
    %c0_16 = arith.constant 0 : index
    %19 = vector.load %arg7[%c0_15, %c0_16] : memref<1x128xf32, #tpu.memory_space<vmem>>, vector<1x128xf32>
    %20 = vector.broadcast %19 : vector<1x128xf32> to vector<64x128xf32>
    %21 = arith.addf %18, %20 : vector<64x128xf32>
    %22 = tpu.iota {dimensions = array<i32: 1>} : vector<64x128xi32>
    %c10_i32 = arith.constant 10 : i32
    %23 = vector.broadcast %c10_i32 : i32 to vector<64x128xi32>
    %24 = arith.cmpi slt, %22, %23 : vector<64x128xi32>
    %cst_17 = arith.constant 0xFF800000 : f32
    %25 = vector.broadcast %cst_17 : f32 to vector<64x128xf32>
    %26 = arith.select %24, %21, %25 : vector<64x128xi1>, vector<64x128xf32>
    %cst_18 = arith.constant dense<0xFF800000> : vector<64xf32>
    %27 = vector.multi_reduction <maximumf>, %26, %cst_18 [1] : vector<64x128xf32> to vector<64xf32>
    %28 = vector.shape_cast %27 : vector<64xf32> to vector<64x1xf32>
    %29 = vector.broadcast %28 : vector<64x1xf32> to vector<64x128xf32>
    %30 = arith.subf %26, %29 : vector<64x128xf32>
    %31 = math.exp %30 : vector<64x128xf32>
    %cst_19 = arith.constant dense<0.000000e+00> : vector<64xf32>
    %32 = vector.multi_reduction <add>, %31, %cst_19 [1] : vector<64x128xf32> to vector<64xf32>
    %33 = vector.shape_cast %32 : vector<64xf32> to vector<64x1xf32>
    %34 = vector.broadcast %33 : vector<64x1xf32> to vector<64x128xf32>
    %35 = arith.divf %31, %34 : vector<64x128xf32>
    %c0_20 = arith.constant 0 : index
    %c0_21 = arith.constant 0 : index
    %36 = vector.load %arg8[%c0_20, %c0_21] : memref<64x128xf32, #tpu.memory_space<vmem>>, vector<64x128xf32>
    tpu.vector_store %arg8[%c0_20, %c0_21], %35 {strides = array<i32>} : memref<64x128xf32, #tpu.memory_space<vmem>>, vector<64x128xf32>,
    return
  }
  func.func @transform_0(%arg0: i32) -> (i32, i32) {
    %c0_i32 = arith.constant 0 : i32
    %c0_i32_0 = arith.constant 0 : i32
    return %arg0, %c0_i32 : i32, i32
  }
  func.func @transform_1(%arg0: i32) -> (i32, i32) {
    %c0_i32 = arith.constant 0 : i32
    %c0_i32_0 = arith.constant 0 : i32
    %c0_i32_1 = arith.constant 0 : i32
    return %c0_i32, %c0_i32_0 : i32, i32
  }
  func.func @transform_2(%arg0: i32) -> (i32, i32) {
    %c0_i32 = arith.constant 0 : i32
    %c0_i32_0 = arith.constant 0 : i32
    %c0_i32_1 = arith.constant 0 : i32
    return %c0_i32, %c0_i32_0 : i32, i32
  }
  func.func @transform_3(%arg0: i32) -> (i32, i32) {
    %c0_i32 = arith.constant 0 : i32
    %c0_i32_0 = arith.constant 0 : i32
    %c0_i32_1 = arith.constant 0 : i32
    return %c0_i32, %c0_i32_0 : i32, i32
  }
  func.func @transform_4(%arg0: i32) -> (i32, i32) {
    %c0_i32 = arith.constant 0 : i32
    %c0_i32_0 = arith.constant 0 : i32
    %c0_i32_1 = arith.constant 0 : i32
    return %c0_i32, %c0_i32_0 : i32, i32
  }
  func.func @transform_5(%arg0: i32) -> (i32, i32) {
    %c0_i32 = arith.constant 0 : i32
    %c0_i32_0 = arith.constant 0 : i32
    %c0_i32_1 = arith.constant 0 : i32
    return %c0_i32, %c0_i32_0 : i32, i32
  }
  func.func @transform_6(%arg0: i32) -> (i32, i32) {
    %c0_i32 = arith.constant 0 : i32
    %c0_i32_0 = arith.constant 0 : i32
    %c0_i32_1 = arith.constant 0 : i32
    return %c0_i32, %c0_i32_0 : i32, i32
  }
  func.func @transform_7(%arg0: i32) -> (i32, i32) {
    %c0_i32 = arith.constant 0 : i32
    %c0_i32_0 = arith.constant 0 : i32
    return %arg0, %c0_i32 : i32, i32
  }
}

</mosaic_0001>

<bundles_post_ra>
// kernel: tpu_custom_call.1
= control target key start
LH: loop header
LB: loop body
LE: loop exit
PB: predicated region body
PF: predicated region fallthrough
CT: control target
= control target key end

     0   :  { %12 = vsyncpa [#allocation3], 0  ;;  %s2136_s0 = inlined_call_operand.hbm [shape: bf16[64,784], index: 0, kind: input, shape index: {}]   ;;  %s2137_s1 = inlined_call_operand.hbm [shape: bf16[784,128], index: 1, kind: input, shape index: {}]   ;;  %s2138_s2 = inlined_call_operand.vmem [shape: f32[1,128], index: 2, kind: input, shape index: {}]   ;;  %s2139_s3 = inlined_call_operand.hbm [shape: bf16[128,128], index: 3, kind: input, shape index: {}]   ;;  %s2140_s4 = inlined_call_operand.vmem [shape: f32[1,128], index: 4, kind: input, shape index: {}]   ;;  %s2141_s5 = inlined_call_operand.hbm [shape: bf16[128,128], index: 5, kind: input, shape index: {}]   ;;  %s2142_s6 = inlined_call_operand.vmem [shape: f32[1,128], index: 6, kind: input, shape index: {}]   ;;  %s2143_s7 = inlined_call_operand.hbm [shape: f32[64,128], index: 7, kind: output, shape index: {}]  }
   0x1   :  { %13 = vsyncpa [#allocation6], 0 }
   0x2   :  { %14 = vsyncpa [#allocation9], 0  ;;  %s33_s26 = sshll.u32 %s2137_s1, 4  ;;  %s34_s26 = int_to_ptr.hbm [resolvable:$true] %s33_s26 }
   0x3   :  { %15 = vsyncpa [#allocation4], 0  ;;  %s1968_s27 = smov [#allocation5]   ;;  %s20_s8 = sshll.u32 %s2136_s0, 4  ;;  %s21_s8 = int_to_ptr.hbm [resolvable:$true] %s20_s8 }
   0x4   :  { %s35_s28 = sshll.u32 %s1968_s27, 4  ;;  %s1969_s9 = smov 64   ;;  %s36_s28 = int_to_ptr.vmem [resolvable:$true] %s35_s28 }
   0x5   :  { %s1970_s10 = smov 4   ;;  %s1971_s11 = smov [#allocation2]  }
   0x6   :  { %41 = dma.hbm_to_vmem [thread:$0]  %s34_s26, 6272, %s36_s28, [#allocation6], %s1969_s9, %s1969_s9, %s1970_s10  }
   0x7   :  { %s22_s12 = sshll.u32 %s1971_s11, 4  ;;  %s1972_s13 = smov 448   ;;  %s23_s12 = int_to_ptr.vmem [resolvable:$true] %s22_s12 }
   0x8   :  { %s1973_s14 = smov 28   ;;  %s48_s16 = sshll.u32 %s2139_s3, 4  ;;  %s49_s16 = int_to_ptr.hbm [resolvable:$true] %s48_s16 }
   0x9   :  { %28 = dma.hbm_to_vmem [thread:$0]  %s21_s8, 3584, %s23_s12, [#allocation3], %s1972_s13, %s1972_s13, %s1973_s14  }
   0xa   :  { %s1974_s17 = smov [#allocation7]   ;;  %s63_s20 = sshll.u32 %s2141_s5, 4  ;;  %s64_s20 = int_to_ptr.hbm [resolvable:$true] %s63_s20 }
   0xb   :  { %s50_s18 = sshll.u32 %s1974_s17, 4  ;;  %s1975_s21 = smov [#allocation8]   ;;  %s51_s18 = int_to_ptr.vmem [resolvable:$true] %s50_s18 }
   0xc   :  { %56 = dma.hbm_to_vmem [thread:$0]  %s49_s16, 1024, %s51_s18, [#allocation6], %s1969_s9, %s1969_s9, %s1970_s10  }
   0xd   :  { %s65_s22 = sshll.u32 %s1975_s21, 4  ;;  %s66_s22 = int_to_ptr.vmem [resolvable:$true] %s65_s22 }
   0xe   :  { %71 = dma.hbm_to_vmem [thread:$0]  %s64_s20, 1024, %s66_s22, [#allocation9], %s1969_s9, %s1969_s9, %s1970_s10  }
   0xf   :  { %1960 = dma.done.wait [#allocation3], 3584  }
  0x10   :  { %1961 = vsyncadd [#allocation3], 4294963712 }
  0x11   :  { %1962 = dma.done.wait [#allocation6], 7296  }
  0x12   :  { %1963 = vsyncadd [#allocation6], 4294960000 }
  0x13   :  { %1964 = dma.done.wait [#allocation9], 1024  }
  0x14   :  { %1965 = vsyncadd [#allocation9], 4294966272  ;;  %v1720_v0 = vld [vmem:[#allocation5 + $0x38] sm:$0xff]  ;;  %v1719_v2 = vld [vmem:[#allocation5 + $0x30] sm:$0xff]  ;;  %vm659_vm0 = vcmask 130048   ;;  %s1294_s28 = sshll.u32 %s2143_s7, 4  ;;  %s1295_s28 = int_to_ptr.hbm [resolvable:$true] %s1294_s28 }
  0x15   :  { %v1736_v1 = vld [vmem:[#allocation5 + $0xb8] sm:$0xff]  ;;  %1778 = vmatpush.bf16.msra.mxu1 %v1720_v0  ;;  %v1735_v3 = vld [vmem:[#allocation5 + $0xb0] sm:$0xff]  ;;  %672 = vmatpush.bf16.msra.mxu0 %v1720_v0  ;;  %v1718_v5 = vld [vmem:[#allocation5 + $0x28] sm:$0xff]  ;;  %s1977_s29 = smov 128   ;;  %s1978_s30 = smov 8  }
  0x16   :  { %730 = vmatpush.bf16.msra.mxu2 %v1736_v1  ;;  %v1744_v4 = vld [vmem:[#allocation5 + $0xf8] sm:$0xff]  ;;  %v1734_v6 = vld [vmem:[#allocation5 + $0xa8] sm:$0xff]  ;;  %v1743_v7 = vld [vmem:[#allocation5 + $0xf0] sm:$0xff] }
  0x17   :  { %759 = vmatpush.bf16.msra.mxu3 %v1744_v4  ;;  %v1717_v8 = vld [vmem:[#allocation5 + $0x20] sm:$0xff]  ;;  %v1742_v10 = vld [vmem:[#allocation5 + $0xe8] sm:$0xff]  ;;  %v1716_v11 = vld [vmem:[#allocation5 + $0x18] sm:$0xff] }
  0x18   :  { %v1733_v9 = vld [vmem:[#allocation5 + $0xa0] sm:$0xff]  ;;  %v1732_v12 = vld [vmem:[#allocation5 + $0x98] sm:$0xff]  ;;  %v1715_v14 = vld [vmem:[#allocation5 + $0x10] sm:$0xff] }
  0x19   :  { %1779 = vmatpush.bf16.msra.mxu1 %v1719_v2  ;;  %673 = vmatpush.bf16.msra.mxu0 %v1719_v2  ;;  %v1741_v13 = vld [vmem:[#allocation5 + $0xe0] sm:$0xff]  ;;  %v1731_v15 = vld [vmem:[#allocation5 + $0x90] sm:$0xff]  ;;  %v1740_v16 = vld [vmem:[#allocation5 + $0xd8] sm:$0xff] }
  0x1a   :  { %731 = vmatpush.bf16.msra.mxu2 %v1735_v3  ;;  %v1714_v17 = vld [vmem:[#allocation5 + $0x8] sm:$0xff]  ;;  %v1739_v19 = vld [vmem:[#allocation5 + $0xd0] sm:$0xff]  ;;  %v1713_v20 = vld [vmem:[#allocation5] sm:$0xff] }
  0x1b   :  { %760 = vmatpush.bf16.msra.mxu3 %v1743_v7  ;;  %v1730_v18 = vld [vmem:[#allocation5 + $0x88] sm:$0xff]  ;;  %v1367_v21 = vld [vmem:[#allocation2 + $0x70] sm:$0xf]  ;;  %v1729_v23 = vld [vmem:[#allocation5 + $0x80] sm:$0xff] }
  0x1c   :  { %v1702_v22 = vld [vmem:[#allocation2 + $0x88] sm:$0xf0]  ;;  %v1319_v24 = vld [vmem:[#allocation2 + $0x8] sm:$0xf]  ;;  %v1689_v25 = vld [vmem:[#allocation2 + $0x20] sm:$0xf0] }
  0x1d   :  { %1780 = vmatpush.bf16.msra.mxu1 %v1718_v5  ;;  %674 = vmatpush.bf16.msra.mxu0 %v1718_v5  ;;  %v1728_v26 = vld [vmem:[#allocation5 + $0x78] sm:$0xff]  ;;  %v1311_v27 = vld [vmem:[#allocation2] sm:$0xf]  ;;  %v1368_v30 = vor.u32 %v1702_v22, %v1367_v21  ;;  %v1320_v31 = vor.u32 %v1689_v25, %v1319_v24  ;;  %v1738_v33 = vld [vmem:[#allocation5 + $0xc8] sm:$0xff] }
  0x1e   :  { %732 = vmatpush.bf16.msra.mxu2 %v1734_v6  ;;  %v1688_v28 = vld [vmem:[#allocation2 + $0x18] sm:$0xf0]  ;;  %v1727_v34 = vld [vmem:[#allocation5 + $0x70] sm:$0xff]  ;;  %v1737_v36 = vld [vmem:[#allocation5 + $0xc0] sm:$0xff] }
  0x1f   :  { %761 = vmatpush.bf16.msra.mxu3 %v1742_v10  ;;  %v1752_v29 = vld [vmem:[#allocation5 + $0x138] sm:$0xff]  ;;  %v1312_v32 = vor.u32 %v1688_v28, %v1311_v27  ;;  %v1751_v35 = vld [vmem:[#allocation5 + $0x130] sm:$0xff]  ;;  %v1686_v37 = vld [vmem:[#allocation2 + $0xc] sm:$0xf] }
  0x20   :  { %v1321_v38 = vld [vmem:[#allocation2 + $0x24] sm:$0xf0]  ;;  %v1725_v42 = vld [vmem:[#allocation5 + $0x60] sm:$0xff]  ;;  %v1696_v47 = vld [vmem:[#allocation2 + $0x58] sm:$0xf0] }
  0x21   :  { %1781 = vmatpush.bf16.msra.mxu1 %v1717_v8  ;;  %675 = vmatpush.bf16.msra.mxu0 %v1717_v8  ;;  %v1726_v39 = vld [vmem:[#allocation5 + $0x68] sm:$0xff]  ;;  %v1324_v41 = vor.u32 %v1686_v37, %v1321_v38  ;;  %v1749_v43 = vld [vmem:[#allocation5 + $0x120] sm:$0xff]  ;;  %v1724_v48 = vld [vmem:[#allocation5 + $0x58] sm:$0xff] }
  0x22   :  { %733 = vmatpush.bf16.msra.mxu2 %v1733_v9  ;;  %v1750_v40 = vld [vmem:[#allocation5 + $0x128] sm:$0xff]  ;;  %v1709_v45 = vld [vmem:[#allocation2 + $0xc0] sm:$0xf0]  ;;  %v1347_v46 = vld [vmem:[#allocation2 + $0x40] sm:$0xf] }
  0x23   :  { %762 = vmatpush.bf16.msra.mxu3 %v1741_v13  ;;  %v1395_v44 = vld [vmem:[#allocation2 + $0xa8] sm:$0xf]  ;;  %v1339_v49 = vld [vmem:[#allocation2 + $0x38] sm:$0xf]  ;;  %v1695_v50 = vld [vmem:[#allocation2 + $0x50] sm:$0xf0]  ;;  %v1348_v53 = vor.u32 %v1696_v47, %v1347_v46 }
  0x24   :  { %v1748_v51 = vld [vmem:[#allocation5 + $0x118] sm:$0xff]  ;;  %v1396_v52 = vor.u32 %v1709_v45, %v1395_v44  ;;  %v1340_v54 = vor.u32 %v1695_v50, %v1339_v49  ;;  %v1723_v55 = vld [vmem:[#allocation5 + $0x50] sm:$0xff]  ;;  %v1693_v57 = vld [vmem:[#allocation2 + $0x44] sm:$0xf] }
  0x25   :  { %1782 = vmatpush.bf16.msra.mxu1 %v1716_v11  ;;  %676 = vmatpush.bf16.msra.mxu0 %v1716_v11  ;;  %v1747_v56 = vld [vmem:[#allocation5 + $0x110] sm:$0xff]  ;;  %v1349_v58 = vld [vmem:[#allocation2 + $0x5c] sm:$0xf0]  ;;  %v1722_v59 = vld [vmem:[#allocation5 + $0x48] sm:$0xff] }
  0x26   :  { %734 = vmatpush.bf16.msra.mxu2 %v1732_v12  ;;  %v1746_v60 = vld [vmem:[#allocation5 + $0x108] sm:$0xff]  ;;  %v1352_v61 = vor.u32 %v1693_v57, %v1349_v58  ;;  %v1721_v62 = vld [vmem:[#allocation5 + $0x40] sm:$0xff]  ;;  %v1760_v63 = vld [vmem:[#allocation5 + $0x178] sm:$0xff] }
  0x27   :  { %763 = vmatpush.bf16.msra.mxu3 %v1740_v16  ;;  %v1745_v0 = vld [vmem:[#allocation5 + $0x100] sm:$0xff]  ;;  %v1375_v3 = vld [vmem:[#allocation2 + $0x78] sm:$0xf]  ;;  %v1703_v4 = vld [vmem:[#allocation2 + $0x90] sm:$0xf0] }
  0x28   :  { %v1685_v1 = vld [vmem:[#allocation2 + $0x4] sm:$0xf]  ;;  %v1313_v2 = vld [vmem:[#allocation2 + $0x1c] sm:$0xf0]  ;;  %v1327_v5 = vld [vmem:[#allocation2 + $0x10] sm:$0xf]  ;;  %v1376_v9 = vor.u32 %v1703_v4, %v1375_v3 }
  0x29   :  { %1783 = vmatpush.bf16.msra.mxu1 %v1715_v14  ;;  %677 = vmatpush.bf16.msra.mxu0 %v1715_v14  ;;  %v1690_v6 = vld [vmem:[#allocation2 + $0x28] sm:$0xf0]  ;;  %v1759_v7 = vld [vmem:[#allocation5 + $0x170] sm:$0xff]  ;;  %v1316_v8 = vor.u32 %v1685_v1, %v1313_v2  ;;  %v1700_v12 = vld [vmem:[#allocation2 + $0x7c] sm:$0xf] }
  0x2a   :  { %735 = vmatpush.bf16.msra.mxu2 %v1731_v15  ;;  %v1328_v10 = vor.u32 %v1690_v6, %v1327_v5  ;;  %v1758_v11 = vld [vmem:[#allocation5 + $0x168] sm:$0xff]  ;;  %v1377_v13 = vld [vmem:[#allocation2 + $0x94] sm:$0xf0]  ;;  %v1761_v14 = vld [vmem:[#allocation5 + $0x180] sm:$0xff] }
  0x2b   :  { %764 = vmatpush.bf16.msra.mxu3 %v1739_v19  ;;  %v1757_v15 = vld [vmem:[#allocation5 + $0x160] sm:$0xff]  ;;  %v1380_v16 = vor.u32 %v1700_v12, %v1377_v13  ;;  %v1341_v19 = vld [vmem:[#allocation2 + $0x54] sm:$0xf0]  ;;  %v1710_v21 = vld [vmem:[#allocation2 + $0xc8] sm:$0xf0] }
  0x2c   :  { %v1355_v22 = vld [vmem:[#allocation2 + $0x48] sm:$0xf]  ;;  %v1755_v24 = vld [vmem:[#allocation5 + $0x150] sm:$0xff]  ;;  %v1383_v37 = vld [vmem:[#allocation2 + $0x80] sm:$0xf] }
  0x2d   :  { %1784 = vmatpush.bf16.msra.mxu1 %v1714_v17  ;;  %678 = vmatpush.bf16.msra.mxu0 %v1714_v17  ;;  %v1756_v17 = vld [vmem:[#allocation5 + $0x158] sm:$0xff]  ;;  %v1754_v28 = vld [vmem:[#allocation5 + $0x148] sm:$0xff]  ;;  %v1691_v45 = vld [vmem:[#allocation2 + $0x30] sm:$0xf0] }
  0x2e   :  { %736 = vmatpush.bf16.msra.mxu2 %v1730_v18  ;;  %v1692_v18 = vld [vmem:[#allocation2 + $0x3c] sm:$0xf]  ;;  %v1335_v44 = vld [vmem:[#allocation2 + $0x18] sm:$0xf]  ;;  %v1329_v49 = vld [vmem:[#allocation2 + $0x2c] sm:$0xf0] }
  0x2f   :  { %765 = vmatpush.bf16.msra.mxu3 %v1738_v33  ;;  %v1344_v25 = vor.u32 %v1692_v18, %v1341_v19  ;;  %v1699_v33 = vld [vmem:[#allocation2 + $0x74] sm:$0xf]  ;;  %v1704_v38 = vld [vmem:[#allocation2 + $0x98] sm:$0xf0]  ;;  %v1336_v47 = vor.u32 %v1691_v45, %v1335_v44  ;;  %v1363_v50 = vld [vmem:[#allocation2 + $0x50] sm:$0xf] }
  0x30   :  { %v1705_v57 = vld [vmem:[#allocation2 + $0xa0] sm:$0xf0]  ;;  %v1708_v5 = vld [vmem:[#allocation2 + $0xbc] sm:$0xf]  ;;  %v1413_v6 = vld [vmem:[#allocation2 + $0xd4] sm:$0xf0] }
  0x31   :  { %1785 = vmatpush.bf16.msra.mxu1 %v1713_v20  ;;  %679 = vmatpush.bf16.msra.mxu0 %v1713_v20  ;;  %v1403_v20 = vld [vmem:[#allocation2 + $0xb0] sm:$0xf] }
  0x32   :  { %737 = vmatpush.bf16.msra.mxu2 %v1729_v23  ;;  %v1697_v23 = vld [vmem:[#allocation2 + $0x60] sm:$0xf0] }
  0x33   :  { %766 = vmatpush.bf16.msra.mxu3 %v1737_v36  ;;  %v1356_v27 = vor.u32 %v1697_v23, %v1355_v22  ;;  %v1711_v36 = vld [vmem:[#allocation2 + $0xd0] sm:$0xf0] }
  0x34   :  { %690 = vmatmul.bf16.vlgmr.msra.gmra.mxu1 %v1368_v30  ;;  %680 = vmatmul.bf16.vlgmr.msra.gmra.mxu0 %v1312_v32  ;;  %v1405_v30 = vld [vmem:[#allocation2 + $0xcc] sm:$0xf0] }
  0x35   :  { %701 = vmatpush.bf16.msrb.mxu1 %v1728_v26  ;;  %788 = vmatpush.bf16.msrb.mxu0 %v1752_v29  ;;  %v1404_v26 = vor.u32 %v1710_v21, %v1403_v20  ;;  %v1767_v22 = vld [vmem:[#allocation7 + $0x28] sm:$0xff] }
  0x36   :  { %1786 = vmatpush.bf16.msrb.mxu2 %v1752_v29  ;;  %767 = vmatmul.bf16.vlgmr.msra.gmra.mxu3 %v1324_v41  ;;  %v1707_v29 = vld [vmem:[#allocation2 + $0xb4] sm:$0xf]  ;;  %v1384_v41 = vor.u32 %v1704_v38, %v1383_v37 }
  0x37   :  { %738 = vmatmul.bf16.vlgmr.msra.gmra.mxu2 %v1320_v31  ;;  %v1753_v31 = vld [vmem:[#allocation5 + $0x140] sm:$0xff]  ;;  %v1408_v32 = vor.u32 %v1707_v29, %v1405_v30 }
  0x39   :  { %702 = vmatpush.bf16.msrb.mxu1 %v1727_v34  ;;  %789 = vmatpush.bf16.msrb.mxu0 %v1751_v35  ;;  %v1369_v34 = vld [vmem:[#allocation2 + $0x8c] sm:$0xf0] }
  0x3a   :  { %1787 = vmatpush.bf16.msrb.mxu2 %v1751_v35  ;;  %v1411_v35 = vld [vmem:[#allocation2 + $0xb8] sm:$0xf] }
  0x3d   :  { %703 = vmatpush.bf16.msrb.mxu1 %v1726_v39  ;;  %790 = vmatpush.bf16.msrb.mxu0 %v1750_v40  ;;  %v1372_v39 = vor.u32 %v1699_v33, %v1369_v34  ;;  %v1765_v34 = vld [vmem:[#allocation7 + $0x18] sm:$0xff] }
  0x3e   :  { %1788 = vmatpush.bf16.msrb.mxu2 %v1750_v40  ;;  %v1412_v40 = vor.u32 %v1711_v36, %v1411_v35 }
  0x41   :  { %704 = vmatpush.bf16.msrb.mxu1 %v1725_v42  ;;  %791 = vmatpush.bf16.msrb.mxu0 %v1749_v43  ;;  %v1706_v42 = vld [vmem:[#allocation2 + $0xac] sm:$0xf] }
  0x42   :  { %1789 = vmatpush.bf16.msrb.mxu2 %v1749_v43  ;;  %v1397_v43 = vld [vmem:[#allocation2 + $0xc4] sm:$0xf0] }
  0x43   :  { %v1400_v46 = vor.u32 %v1706_v42, %v1397_v43 }
  0x44   :  { %695 = vmatmul.bf16.gmra.mxu1 %v1396_v52  ;;  %685 = vmatmul.bf16.gmra.mxu0 %v1340_v54  ;;  %v1694_v54 = vld [vmem:[#allocation2 + $0x4c] sm:$0xf] }
  0x45   :  { %705 = vmatpush.bf16.msrb.mxu1 %v1724_v48  ;;  %792 = vmatpush.bf16.msrb.mxu0 %v1748_v51  ;;  %v1687_v48 = vld [vmem:[#allocation2 + $0x14] sm:$0xf] }
  0x46   :  { %1790 = vmatpush.bf16.msrb.mxu2 %v1748_v51  ;;  %772 = vmatmul.bf16.gmra.mxu3 %v1352_v61  ;;  %v1698_v51 = vld [vmem:[#allocation2 + $0x68] sm:$0xf0]  ;;  %v1332_v52 = vor.u32 %v1687_v48, %v1329_v49  ;;  %v1385_v61 = vld [vmem:[#allocation2 + $0x9c] sm:$0xf0] }
  0x47   :  { %743 = vmatmul.bf16.gmra.mxu2 %v1348_v53  ;;  %v1364_v53 = vor.u32 %v1698_v51, %v1363_v50 }
  0x49   :  { %706 = vmatpush.bf16.msrb.mxu1 %v1723_v55  ;;  %793 = vmatpush.bf16.msrb.mxu0 %v1747_v56  ;;  %v1357_v55 = vld [vmem:[#allocation2 + $0x64] sm:$0xf0] }
  0x4a   :  { %1791 = vmatpush.bf16.msrb.mxu2 %v1747_v56  ;;  %v1391_v56 = vld [vmem:[#allocation2 + $0x88] sm:$0xf]  ;;  %v1360_v58 = vor.u32 %v1694_v54, %v1357_v55 }
  0x4b   :  { %v1762_v54 = vld [vmem:[#allocation7] sm:$0xff] }
  0x4d   :  { %707 = vmatpush.bf16.msrb.mxu1 %v1722_v59  ;;  %794 = vmatpush.bf16.msrb.mxu0 %v1746_v60  ;;  %v1392_v59 = vor.u32 %v1705_v57, %v1391_v56 }
  0x4e   :  { %1792 = vmatpush.bf16.msrb.mxu2 %v1746_v60  ;;  %v1701_v60 = vld [vmem:[#allocation2 + $0x84] sm:$0xf] }
  0x51   :  { %708 = vmatpush.bf16.msrb.mxu1 %v1721_v62  ;;  %795 = vmatpush.bf16.msrb.mxu0 %v1745_v0  ;;  %v1419_v62 = vld [vmem:[#allocation2 + $0xc0] sm:$0xf] }
  0x52   :  { %1793 = vmatpush.bf16.msrb.mxu2 %v1745_v0  ;;  %v1388_v0 = vor.u32 %v1701_v60, %v1385_v61 }
  0x54   :  { %709 = vmatmul.bf16.vlgmr.msrb.gmra.mxu1 %v1316_v8  ;;  %796 = vmatmul.bf16.vlgmr.msrb.gmra.mxu0 %v1328_v10  ;;  %v1416_v8 = vor.u32 %v1708_v5, %v1413_v6  ;;  %v1769_v10 = vld [vmem:[#allocation7 + $0x38] sm:$0xff] }
  0x55   :  { %817 = vmatpush.bf16.msra.mxu1 %v1760_v63  ;;  %v1712_v63 = vld [vmem:[#allocation2 + $0xd8] sm:$0xf0]  ;;  %955 = vmatpush.bf16.msrb.mxu3 %v1769_v10 }
  0x56   :  { %853 = vmatpush.bf16.msra.mxu2 %v1761_v14  ;;  %777 = vmatmul.bf16.gmra.mxu3 %v1380_v16  ;;  %v1420_v1 = vor.u32 %v1712_v63, %v1419_v62  ;;  %v2042_v16 = vld [vmem:[%s2138_s2] ss:$0 sm:$0xff] }
  0x57   :  { %748 = vmatmul.bf16.gmra.mxu2 %v1376_v9 }
  0x59   :  { %818 = vmatpush.bf16.msra.mxu1 %v1759_v7 }
  0x5d   :  { %819 = vmatpush.bf16.msra.mxu1 %v1758_v11 }
  0x61   :  { %820 = vmatpush.bf16.msra.mxu1 %v1757_v15  ;;  %v1768_v15 = vld [vmem:[#allocation7 + $0x30] sm:$0xff] }
  0x62   :  { %956 = vmatpush.bf16.msrb.mxu3 %v1768_v15 }
  0x64   :  { %714 = vmatmul.bf16.gmra.mxu1 %v1344_v25  ;;  %801 = vmatmul.bf16.gmra.mxu0 %v1356_v27  ;;  %v1766_v27 = vld [vmem:[#allocation7 + $0x20] sm:$0xff] }
  0x65   :  { %821 = vmatpush.bf16.msra.mxu1 %v1756_v17 }
  0x66   :  { %782 = vmatmul.bf16.gmra.mxu3 %v1408_v32 }
  0x67   :  { %753 = vmatmul.bf16.gmra.mxu2 %v1404_v26  ;;  %957 = vmatpush.bf16.msrb.mxu3 %v1767_v22 }
  0x69   :  { %822 = vmatpush.bf16.msra.mxu1 %v1755_v24 }
  0x6b   :  { %958 = vmatpush.bf16.msrb.mxu3 %v1766_v27 }
  0x6d   :  { %823 = vmatpush.bf16.msra.mxu1 %v1754_v28 }
  0x6f   :  { %959 = vmatpush.bf16.msrb.mxu3 %v1765_v34 }
  0x71   :  { %824 = vmatpush.bf16.msra.mxu1 %v1753_v31 }
  0x74   :  { %719 = vmatmul.bf16.gmra.mxu1 %v1372_v39  ;;  %806 = vmatmul.bf16.gmra.mxu0 %v1384_v41  ;;  %v1764_v39 = vld [vmem:[#allocation7 + $0x10] sm:$0xff] }
  0x75   :  { %960 = vmatpush.bf16.msrb.mxu3 %v1764_v39 }
  0x77   :  { %811 = vmatmul.bf16.vlgmr.msrb.gmra.mxu2 %v1412_v40 }
  0x84   :  { %724 = vmatmul.bf16.gmra.mxu1 %v1400_v46  ;;  %v1763_v46 = vld [vmem:[#allocation7 + $0x8] sm:$0xff] }
  0x85   :  { %961 = vmatpush.bf16.msrb.mxu3 %v1763_v46 }
  0x87   :  { %1617 = vmatmul.msk.bf16.vlgmr.msra.gmra.mxu2 %vm659_vm0, %v1336_v47 }
  0x89   :  { %962 = vmatpush.bf16.msrb.mxu3 %v1762_v54  ;;  %v1776_v54 = vld [vmem:[#allocation8 + $0x30] sm:$0xff] }
  0x94   :  { %825 = vmatmul.bf16.vlgmr.msra.gmra.mxu1 %v1332_v52 }
  0x97   :  { %1618 = vmatmul.msk.bf16.gmra.mxu2 %vm659_vm0, %v1364_v53 }
  0xa4   :  { %830 = vmatmul.bf16.gmra.mxu1 %v1360_v58 }
  0xa7   :  { %1619 = vmatmul.msk.bf16.gmra.mxu2 %vm659_vm0, %v1392_v59 }
  0xb1   :  { %v691_v2 = vpop.f32.mrf.mxu1  ;;  %v681_v13 = vpop.f32.mrf.mxu0 }
  0xb2   :  { %v682_v17 = vadd.f32 %v2042_v16, %v681_v13  ;;  %v692_v42 = vadd.f32 %v2042_v16, %v691_v2 }
  0xb4   :  { %835 = vmatmul.bf16.gmra.mxu1 %v1388_v0 }
  0xb7   :  { %1620 = vmatmul.msk.bf16.gmra.mxu2 %vm659_vm0, %v1420_v1 }
  0xb9   :  { %v693_v4 = vpop.f32.mrf.mxu1  ;;  %v2037_v12 = vpop.f32.mrf.mxu3 }
  0xba   :  { %v739_v3 = vpop.f32.mrf.mxu2  ;;  %v683_v23 = vpop.f32.mrf.mxu0  ;;  %v694_v48 = vadd.f32 %v2042_v16, %v693_v4 }
  0xbb   :  { %v684_v0 = vadd.f32 %v2042_v16, %v683_v23 }
  0xc1   :  { %v696_v9 = vpop.f32.mrf.mxu1  ;;  %v2047_v20 = vpop.f32.mrf.mxu3 }
  0xc2   :  { %v2035_v7 = vpop.f32.mrf.mxu2  ;;  %v686_v29 = vpop.f32.mrf.mxu0  ;;  %v697_v56 = vadd.f32 %v2042_v16, %v696_v9 }
  0xc3   :  { %v687_v30 = vadd.f32 %v2042_v16, %v686_v29 }
  0xc4   :  { %840 = vmatmul.bf16.gmra.mxu1 %v1416_v8 }
  0xc9   :  { %v698_v14 = vpop.f32.mrf.mxu1  ;;  %v2049_v28 = vpop.f32.mrf.mxu3 }
  0xca   :  { %v744_v11 = vpop.f32.mrf.mxu2  ;;  %v688_v49 = vpop.f32.mrf.mxu0  ;;  %v699_v1 = vadd.f32 %v2042_v16, %v698_v14 }
  0xcb   :  { %v689_v14 = vadd.f32 %v2042_v16, %v688_v49 }
  0xd1   :  { %v710_v19 = vpop.f32.mrf.mxu1  ;;  %v2052_v36 = vpop.f32.mrf.mxu3 }
  0xd2   :  { %v2045_v18 = vpop.f32.mrf.mxu2  ;;  %v711_v21 = vadd.f32 %v710_v19, %v682_v17  ;;  %v797_v59 = vpop.f32.mrf.mxu0 }
  0xd4   :  { %v740_v24 = vadd.f32 %v739_v3, %v711_v21 }
  0xd6   :  { %v769_v10 = vadd.f32 %v2037_v12, %v740_v24 }
  0xd8   :  { %v798_v15 = vadd.f32 %v797_v59, %v769_v10 }
  0xd9   :  { %v712_v26 = vpop.f32.mrf.mxu1  ;;  %v2054_v41 = vpop.f32.mrf.mxu3 }
  0xda   :  { %v749_v25 = vpop.f32.mrf.mxu2  ;;  %v713_v5 = vadd.f32 %v712_v26, %v684_v0  ;;  %v799_v8 = vpop.f32.mrf.mxu0 }
  0xe1   :  { %v715_v32 = vpop.f32.mrf.mxu1  ;;  %v2060_v51 = vpop.f32.mrf.mxu3 }
  0xe2   :  { %v751_v31 = vpop.f32.mrf.mxu2  ;;  %v716_v33 = vadd.f32 %v715_v32, %v687_v30  ;;  %v802_v21 = vpop.f32.mrf.mxu0 }
  0xe4   :  { %v745_v35 = vadd.f32 %v744_v11, %v716_v33  ;;  %v742_v11 = vadd.f32 %v2035_v7, %v713_v5 }
  0xe6   :  { %v771_v17 = vadd.f32 %v2047_v20, %v742_v11  ;;  %v774_v12 = vadd.f32 %v2049_v28, %v745_v35 }
  0xe8   :  { %v800_v22 = vadd.f32 %v799_v8, %v771_v17 }
  0xe9   :  { %v717_v38 = vpop.f32.mrf.mxu1  ;;  %v783_v60 = vpop.f32.mrf.mxu3 }
  0xea   :  { %v754_v37 = vpop.f32.mrf.mxu2  ;;  %v718_v29 = vadd.f32 %v717_v38, %v689_v14  ;;  %v804_v33 = vpop.f32.mrf.mxu0 }
  0xec   :  { %v747_v7 = vadd.f32 %v2045_v18, %v718_v29 }
  0xee   :  { %v776_v16 = vadd.f32 %v2052_v36, %v747_v7 }
  0xf1   :  { %v720_v43 = vpop.f32.mrf.mxu1 }
  0xf2   :  { %v756_v40 = vpop.f32.mrf.mxu2  ;;  %v721_v44 = vadd.f32 %v720_v43, %v692_v42 }
  0xf4   :  { %v2057_v45 = vadd.f32 %v749_v25, %v721_v44  ;;  %v807_v44 = vpop.f32.mrf.mxu0 }
  0xf6   :  { %v779_v18 = vadd.f32 %v2054_v41, %v2057_v45  ;;  %v1774_v45 = vld [vmem:[#allocation8 + $0x20] sm:$0xff] }
  0xf9   :  { %v722_v50 = vpop.f32.mrf.mxu1 }
  0xfa   :  { %v812_v47 = vpop.f32.mrf.mxu2  ;;  %v723_v52 = vadd.f32 %v722_v50, %v694_v48  ;;  %v1777_v50 = vld [vmem:[#allocation8 + $0x38] sm:$0xff] }
  0xfb   :  { %1064 = vmatpush.bf16.msra.mxu0 %v1777_v50  ;;  %v1093_v50 = vlaneseq }
  0xfc   :  { %v2062_v53 = vadd.f32 %v751_v31, %v723_v52  ;;  %v808_v52 = vadd.f32 %v807_v44, %v779_v18 }
  0xfe   :  { %v781_v36 = vadd.f32 %v2060_v51, %v2062_v53  ;;  %v1773_v51 = vld [vmem:[#allocation8 + $0x18] sm:$0xff] }
  0xff   :  { %1065 = vmatpush.bf16.msra.mxu0 %v1776_v54 }
 0x101   :  { %v725_v57 = vpop.f32.mrf.mxu1 }
 0x102   :  { %v2064_v55 = vpop.f32.mrf.mxu2  ;;  %v726_v58 = vadd.f32 %v725_v57, %v697_v56  ;;  %v809_v56 = vpop.f32.mrf.mxu0 }
 0x103   :  { %v810_v59 = vadd.f32 %v809_v56, %v781_v36  ;;  %v1807_v36 = vld [vmem:[%s2142_s6] ss:$0 sm:$0xff]  ;;  %s1976_s6 = smov [#allocation10]  }
 0x104   :  { %v755_v61 = vadd.f32 %v754_v37, %v726_v58  ;;  %v803_v37 = vadd.f32 %v802_v21, %v774_v12  ;;  %s1292_s25 = sshll.u32 %s1976_s6, 4  ;;  %s1293_s25 = int_to_ptr.vmem [resolvable:$true] %s1292_s25 }
 0x106   :  { %v784_v62 = vadd.f32 %v783_v60, %v755_v61  ;;  %v1775_v60 = vld [vmem:[#allocation8 + $0x28] sm:$0xff] }
 0x107   :  { %1066 = vmatpush.bf16.msra.mxu0 %v1775_v60 }
 0x108   :  { %v2069_v2 = vadd.f32 %v812_v47, %v784_v62 }
 0x109   :  { %v727_v3 = vpop.f32.mrf.mxu1 }
 0x10a   :  { %v855_v63 = vpop.f32.mrf.mxu2  ;;  %v728_v4 = vadd.f32 %v727_v3, %v699_v1  ;;  %v785_v3 = vpop.f32.mrf.mxu3 }
 0x10b   :  { %1067 = vmatpush.bf16.msra.mxu0 %v1774_v45 }
 0x10c   :  { %v2071_v6 = vadd.f32 %v756_v40, %v728_v4  ;;  %v805_v40 = vadd.f32 %v804_v33, %v776_v16 }
 0x10e   :  { %v786_v8 = vadd.f32 %v785_v3, %v2071_v6 }
 0x10f   :  { %1068 = vmatpush.bf16.msra.mxu0 %v1773_v51 }
 0x110   :  { %v815_v11 = vadd.f32 %v2064_v55, %v786_v8 }
 0x111   :  { %v826_v13 = vpop.f32.mrf.mxu1 }
 0x112   :  { %v857_v9 = vpop.f32.mrf.mxu2  ;;  %v827_v19 = vadd.f32 %v826_v13, %v798_v15 }
 0x114   :  { %v856_v26 = vadd.f32 %v855_v63, %v827_v19 }
 0x116   :  { %v875_v31 = vmax.f32 %v856_v26, 0.0  ;;  %v1770_v26 = vld [vmem:[#allocation8] sm:$0xff] }
 0x119   :  { %v828_v23 = vpop.f32.mrf.mxu1 }
 0x11a   :  { %v860_v25 = vpop.f32.mrf.mxu2  ;;  %v829_v27 = vadd.f32 %v828_v23, %v800_v22 }
 0x11c   :  { %v858_v30 = vadd.f32 %v857_v9, %v829_v27  ;;  %v1772_v9 = vld [vmem:[#allocation8 + $0x10] sm:$0xff] }
 0x11d   :  { %1069 = vmatpush.bf16.msra.mxu0 %v1772_v9 }
 0x11e   :  { %v876_v32 = vmax.f32 %v858_v30, 0.0 }
 0x120   :  { %v883_v24 = vpack.c.bf16 %v876_v32, %v875_v31 }
 0x121   :  { %v831_v20 = vpop.f32.mrf.mxu1 }
 0x122   :  { %963 = vmatmul.bf16.vlgmr.msrb.gmra.mxu3 %v883_v24  ;;  %v862_v34 = vpop.f32.mrf.mxu2  ;;  %v832_v39 = vadd.f32 %v831_v20, %v803_v37 }
 0x124   :  { %v861_v43 = vadd.f32 %v860_v25, %v832_v39  ;;  %v1771_v25 = vld [vmem:[#allocation8 + $0x8] sm:$0xff] }
 0x125   :  { %1070 = vmatpush.bf16.msra.mxu0 %v1771_v25 }
 0x126   :  { %v877_v48 = vmax.f32 %v861_v43, 0.0 }
 0x129   :  { %v833_v42 = vpop.f32.mrf.mxu1  ;;  %1071 = vmatpush.bf16.msra.mxu0 %v1770_v26 }
 0x12a   :  { %v834_v38 = vadd.f32 %v833_v42, %v805_v40  ;;  %v865_v47 = vpop.f32.mrf.mxu2 }
 0x12c   :  { %v863_v46 = vadd.f32 %v862_v34, %v834_v38 }
 0x12e   :  { %v878_v28 = vmax.f32 %v863_v46, 0.0 }
 0x130   :  { %v884_v35 = vpack.c.bf16 %v878_v28, %v877_v48 }
 0x131   :  { %v836_v49 = vpop.f32.mrf.mxu1 }
 0x132   :  { %968 = vmatmul.bf16.gmra.mxu3 %v884_v35  ;;  %v837_v57 = vadd.f32 %v836_v49, %v808_v52  ;;  %v867_v58 = vpop.f32.mrf.mxu2  ;;  %v1094_v52 = vand.u32 127, %v1093_v50 }
 0x134   :  { %v866_v62 = vadd.f32 %v865_v47, %v837_v57  ;;  %vm1095_vm1 = vcmp.lt.s32.totalorder %v1094_v52, 10 }
 0x136   :  { %v879_v0 = vmax.f32 %v866_v62, 0.0 }
 0x139   :  { %v838_v61 = vpop.f32.mrf.mxu1 }
 0x13a   :  { %v839_v63 = vadd.f32 %v838_v61, %v810_v59  ;;  %v870_v53 = vpop.f32.mrf.mxu2 }
 0x13c   :  { %v868_v41 = vadd.f32 %v867_v58, %v839_v63 }
 0x13e   :  { %v880_v1 = vmax.f32 %v868_v41, 0.0 }
 0x140   :  { %v885_v4 = vpack.c.bf16 %v880_v1, %v879_v0 }
 0x141   :  { %v841_v5 = vpop.f32.mrf.mxu1 }
 0x142   :  { %973 = vmatmul.bf16.gmra.mxu3 %v885_v4  ;;  %v842_v10 = vadd.f32 %v841_v5, %v2069_v2  ;;  %v872_v19 = vpop.f32.mrf.mxu2  ;;  %v1806_v2 = vld [vmem:[%s2140_s4] ss:$0 sm:$0xff] }
 0x144   :  { %v871_v15 = vadd.f32 %v870_v53, %v842_v10 }
 0x146   :  { %v881_v14 = vmax.f32 %v871_v15, 0.0 }
 0x149   :  { %v843_v13 = vpop.f32.mrf.mxu1 }
 0x14a   :  { %v844_v17 = vadd.f32 %v843_v13, %v815_v11 }
 0x14c   :  { %v873_v21 = vadd.f32 %v872_v19, %v844_v17 }
 0x14e   :  { %v882_v22 = vmax.f32 %v873_v21, 0.0 }
 0x150   :  { %v886_v23 = vpack.c.bf16 %v882_v22, %v881_v14 }
 0x152   :  { %978 = vmatmul.bf16.gmra.mxu3 %v886_v23 }
 0x1a5   :  { %v964_v6 = vpop.f32.mrf.mxu3 }
 0x1a6   :  { %v965_v55 = vadd.f32 %v1806_v2, %v964_v6 }
 0x1a8   :  { %v984_v30 = vmax.f32 %v965_v55, 0.0 }
 0x1ad   :  { %v966_v27 = vpop.f32.mrf.mxu3 }
 0x1ae   :  { %v967_v29 = vadd.f32 %v1806_v2, %v966_v27 }
 0x1b0   :  { %v985_v31 = vmax.f32 %v967_v29, 0.0 }
 0x1b2   :  { %v992_v32 = vpack.c.bf16 %v985_v31, %v984_v30 }
 0x1b4   :  { %1072 = vmatmul.bf16.vlgmr.msra.gmra.mxu0 %v992_v32 }
 0x1b5   :  { %v969_v12 = vpop.f32.mrf.mxu3 }
 0x1b6   :  { %v970_v7 = vadd.f32 %v1806_v2, %v969_v12 }
 0x1b8   :  { %v986_v20 = vmax.f32 %v970_v7, 0.0 }
 0x1bd   :  { %v971_v24 = vpop.f32.mrf.mxu3 }
 0x1be   :  { %v972_v33 = vadd.f32 %v1806_v2, %v971_v24 }
 0x1c0   :  { %v987_v34 = vmax.f32 %v972_v33, 0.0 }
 0x1c2   :  { %v993_v37 = vpack.c.bf16 %v987_v34, %v986_v20 }
 0x1c4   :  { %1077 = vmatmul.bf16.gmra.mxu0 %v993_v37 }
 0x1c5   :  { %v974_v16 = vpop.f32.mrf.mxu3 }
 0x1c6   :  { %v975_v39 = vadd.f32 %v1806_v2, %v974_v16 }
 0x1c8   :  { %v988_v43 = vmax.f32 %v975_v39, 0.0 }
 0x1cd   :  { %v976_v40 = vpop.f32.mrf.mxu3 }
 0x1ce   :  { %v977_v42 = vadd.f32 %v1806_v2, %v976_v40 }
 0x1d0   :  { %v989_v38 = vmax.f32 %v977_v42, 0.0 }
 0x1d2   :  { %v994_v44 = vpack.c.bf16 %v989_v38, %v988_v43 }
 0x1d4   :  { %1082 = vmatmul.bf16.gmra.mxu0 %v994_v44 }
 0x1d5   :  { %v979_v46 = vpop.f32.mrf.mxu3 }
 0x1d6   :  { %v980_v47 = vadd.f32 %v1806_v2, %v979_v46 }
 0x1d8   :  { %v990_v18 = vmax.f32 %v980_v47, 0.0 }
 0x1dd   :  { %v981_v48 = vpop.f32.mrf.mxu3 }
 0x1de   :  { %v982_v28 = vadd.f32 %v1806_v2, %v981_v48 }
 0x1e0   :  { %v991_v35 = vmax.f32 %v982_v28, 0.0 }
 0x1e2   :  { %v995_v49 = vpack.c.bf16 %v991_v35, %v990_v18 }
 0x1e4   :  { %1087 = vmatmul.bf16.gmra.mxu0 %v995_v49 }
 0x231   :  { %v1073_v54 = vpop.f32.mrf.mxu0 }
 0x232   :  { %v1074_v56 = vadd.f32 %v1807_v36, %v1073_v54 }
 0x234   :  { %v1096_v57 = vsel %vm1095_vm1, %v1074_v56, -inf }
 0x235   :  { %1104 = vmax.xlane.f32.xlu0 %v1096_v57 }
 0x239   :  { %v1075_v58 = vpop.f32.mrf.mxu0 }
 0x23a   :  { %v1076_v59 = vadd.f32 %v1807_v36, %v1075_v58 }
 0x23c   :  { %v1097_v60 = vsel %vm1095_vm1, %v1076_v59, -inf }
 0x23d   :  { %1106 = vmax.xlane.f32.xlu0 %v1097_v60 }
 0x241   :  { %v1078_v61 = vpop.f32.mrf.mxu0 }
 0x242   :  { %v1079_v62 = vadd.f32 %v1807_v36, %v1078_v61 }
 0x244   :  { %v1098_v63 = vsel %vm1095_vm1, %v1079_v62, -inf }
 0x245   :  { %1108 = vmax.xlane.f32.xlu1 %v1098_v63 }
 0x249   :  { %v1080_v41 = vpop.f32.mrf.mxu0 }
 0x24a   :  { %v1081_v45 = vadd.f32 %v1807_v36, %v1080_v41 }
 0x24c   :  { %v1099_v0 = vsel %vm1095_vm1, %v1081_v45, -inf }
 0x24d   :  { %1110 = vmax.xlane.f32.xlu1 %v1099_v0 }
 0x251   :  { %v1083_v1 = vpop.f32.mrf.mxu0 }
 0x252   :  { %v1084_v3 = vadd.f32 %v1807_v36, %v1083_v1 }
 0x254   :  { %v1100_v4 = vsel %vm1095_vm1, %v1084_v3, -inf }
 0x255   :  { %1112 = vmax.xlane.f32.xlu2 %v1100_v4 }
 0x259   :  { %v1085_v51 = vpop.f32.mrf.mxu0 }
 0x25a   :  { %v1086_v53 = vadd.f32 %v1807_v36, %v1085_v51 }
 0x25c   :  { %v1101_v5 = vsel %vm1095_vm1, %v1086_v53, -inf }
 0x25d   :  { %1114 = vmax.xlane.f32.xlu2 %v1101_v5 }
 0x261   :  { %v1088_v8 = vpop.f32.mrf.mxu0 }
 0x262   :  { %v1089_v9 = vadd.f32 %v1807_v36, %v1088_v8 }
 0x264   :  { %v1102_v10 = vsel %vm1095_vm1, %v1089_v9, -inf }
 0x265   :  { %1116 = vmax.xlane.f32.xlu0 %v1102_v10 }
 0x269   :  { %v1090_v11 = vpop.f32.mrf.mxu0 }
 0x26a   :  { %v1091_v13 = vadd.f32 %v1807_v36, %v1090_v11 }
 0x26c   :  { %v1103_v15 = vsel %vm1095_vm1, %v1091_v13, -inf }
 0x26d   :  { %1118 = vmax.xlane.f32.xlu1 %v1103_v15 }
 0x2a8   :  { %v1105_v17 = vpop.xlane.xlu0 %1104 }
 0x2a9   :  { %v1120_v19 = vsub.f32 %v1096_v57, %v1105_v17 }
 0x2ab   :  { %v1128_v21 = vmul.f32 1.442695, %v1120_v19 }
 0x2ad   :  { %1808 = vpow2.f32 %v1128_v21 }
 0x2b0   :  { %v1107_v14 = vpop.xlane.xlu0 %1106 }
 0x2b1   :  { %v1121_v22 = vsub.f32 %v1097_v60, %v1107_v14 }
 0x2b3   :  { %v2101_v23 = vpop.eup %1808  ;;  %v1130_v25 = vmul.f32 1.442695, %v1121_v22 }
 0x2b4   :  { %1144 = vadd.xlane.f32.xlu2 %v2101_v23 }
 0x2b5   :  { %1810 = vpow2.f32 %v1130_v25 }
 0x2b8   :  { %v1109_v26 = vpop.xlane.xlu1 %1108 }
 0x2b9   :  { %v1122_v6 = vsub.f32 %v1098_v63, %v1109_v26 }
 0x2bb   :  { %v2104_v2 = vpop.eup %1810  ;;  %v1132_v55 = vmul.f32 1.442695, %v1122_v6 }
 0x2bc   :  { %1146 = vadd.xlane.f32.xlu0 %v2104_v2 }
 0x2bd   :  { %1812 = vpow2.f32 %v1132_v55 }
 0x2c0   :  { %v1111_v27 = vpop.xlane.xlu1 %1110 }
 0x2c1   :  { %v1123_v29 = vsub.f32 %v1099_v0, %v1111_v27 }
 0x2c3   :  { %v2107_v30 = vpop.eup %1812  ;;  %v1134_v31 = vmul.f32 1.442695, %v1123_v29 }
 0x2c4   :  { %1148 = vadd.xlane.f32.xlu1 %v2107_v30 }
 0x2c5   :  { %1814 = vpow2.f32 %v1134_v31 }
 0x2c8   :  { %v1113_v32 = vpop.xlane.xlu2 %1112 }
 0x2c9   :  { %v1124_v12 = vsub.f32 %v1100_v4, %v1113_v32 }
 0x2cb   :  { %v2110_v7 = vpop.eup %1814  ;;  %v1136_v24 = vmul.f32 1.442695, %v1124_v12 }
 0x2cc   :  { %1150 = vadd.xlane.f32.xlu2 %v2110_v7 }
 0x2cd   :  { %1816 = vpow2.f32 %v1136_v24 }
 0x2d0   :  { %v1115_v33 = vpop.xlane.xlu2 %1114 }
 0x2d1   :  { %v1125_v20 = vsub.f32 %v1101_v5, %v1115_v33 }
 0x2d3   :  { %v2113_v34 = vpop.eup %1816  ;;  %v1138_v37 = vmul.f32 1.442695, %v1125_v20 }
 0x2d4   :  { %1152 = vadd.xlane.f32.xlu0 %v2113_v34 }
 0x2d5   :  { %1818 = vpow2.f32 %v1138_v37 }
 0x2d8   :  { %v1117_v16 = vpop.xlane.xlu0 %1116 }
 0x2d9   :  { %v1126_v39 = vsub.f32 %v1102_v10, %v1117_v16 }
 0x2db   :  { %v2116_v40 = vpop.eup %1818  ;;  %v1140_v42 = vmul.f32 1.442695, %v1126_v39 }
 0x2dc   :  { %1154 = vadd.xlane.f32.xlu1 %v2116_v40 }
 0x2dd   :  { %1820 = vpow2.f32 %v1140_v42 }
 0x2e0   :  { %v1119_v43 = vpop.xlane.xlu1 %1118 }
 0x2e1   :  { %v1127_v38 = vsub.f32 %v1103_v15, %v1119_v43 }
 0x2e3   :  { %v2119_v44 = vpop.eup %1820  ;;  %v1142_v46 = vmul.f32 1.442695, %v1127_v38 }
 0x2e4   :  { %1156 = vadd.xlane.f32.xlu2 %v2119_v44 }
 0x2e5   :  { %1822 = vpow2.f32 %v1142_v46 }
 0x2eb   :  { %v2122_v47 = vpop.eup %1822 }
 0x2ec   :  { %1158 = vadd.xlane.f32.xlu0 %v2122_v47 }
 0x327   :  { %v1145_v48 = vpop.xlane.xlu2 %1144 }
 0x328   :  { %1824 = vrcp.f32 %v1145_v48  ;;  %v1171_v50 = vand.u32 2147483648, %v1145_v48  ;;  %v1169_v36 = vand.u32 2147483647, %v1145_v48  ;;  %vm1165_vm3 = vweird.f32 %v1145_v48 }
 0x32a   :  { %v1172_v57 = vor.u32 1.1754944e-38, %v1171_v50  ;;  %vm1170_vm5 = vcmp.eq.f32.partialorder %v1169_v36, 8.507059e+37 }
 0x32e   :  { %v1825_v28 = vpop.eup %1824 }
 0x32f   :  { %v1161_v18 = vmul.f32 %v1825_v28, %v1145_v48  ;;  %v1147_v35 = vpop.xlane.xlu0 %1146  ;;  %vm1166_vm2 = vweird.f32 %v1825_v28 }
 0x330   :  { %1826 = vrcp.f32 %v1147_v35  ;;  %vm1167_vm4 = vmor %vm1165_vm3, %vm1166_vm2  ;;  %v1186_v41 = vand.u32 2147483648, %v1147_v35  ;;  %v1184_v0 = vand.u32 2147483647, %v1147_v35  ;;  %vm1180_vm7 = vweird.f32 %v1147_v35 }
 0x331   :  { %v1162_v49 = vsub.f32 1.0, %v1161_v18 }
 0x332   :  { %v1187_v4 = vor.u32 1.1754944e-38, %v1186_v41  ;;  %vm1185_vm9 = vcmp.eq.f32.partialorder %v1184_v0, 8.507059e+37 }
 0x333   :  { %v1163_v52 = vmul.f32 %v1825_v28, %v1162_v49 }
 0x335   :  { %v1164_v54 = vadd.f32 %v1825_v28, %v1163_v52 }
 0x336   :  { %v1827_v56 = vpop.eup %1826 }
 0x337   :  { %v1168_v58 = vsel %vm1167_vm4, %v1825_v28, %v1164_v54  ;;  %v1176_v59 = vmul.f32 %v1827_v56, %v1147_v35  ;;  %v1149_v60 = vpop.xlane.xlu1 %1148  ;;  %vm1181_vm6 = vweird.f32 %v1827_v56 }
 0x338   :  { %v1173_v61 = vsel %vm1170_vm5, %v1172_v57, %v1168_v58  ;;  %1828 = vrcp.f32 %v1149_v60  ;;  %vm1182_vm8 = vmor %vm1180_vm7, %vm1181_vm6  ;;  %v1201_v11 = vand.u32 2147483648, %v1149_v60  ;;  %v1199_v15 = vand.u32 2147483647, %v1149_v60 }
 0x339   :  { %v1174_v62 = vmul.f32 %v2101_v23, %v1173_v61  ;;  %v1177_v63 = vsub.f32 1.0, %v1176_v59  ;;  %vm1195_vm11 = vweird.f32 %v1149_v60 }
 0x33a   :  { %v1202_v21 = vor.u32 1.1754944e-38, %v1201_v11  ;;  %vm1200_vm13 = vcmp.eq.f32.partialorder %v1199_v15, 8.507059e+37 }
 0x33b   :  { %1280 = vst [vmem:[#allocation10] sm:$0xff] %v1174_v62  ;;  %v1178_v45 = vmul.f32 %v1827_v56, %v1177_v63 }
 0x33d   :  { %v1179_v1 = vadd.f32 %v1827_v56, %v1178_v45 }
 0x33e   :  { %v1829_v3 = vpop.eup %1828 }
 0x33f   :  { %v1183_v51 = vsel %vm1182_vm8, %v1827_v56, %v1179_v1  ;;  %v1191_v53 = vmul.f32 %v1829_v3, %v1149_v60  ;;  %v1151_v5 = vpop.xlane.xlu2 %1150  ;;  %vm1196_vm10 = vweird.f32 %v1829_v3 }
 0x340   :  { %v1188_v8 = vsel %vm1185_vm9, %v1187_v4, %v1183_v51  ;;  %1830 = vrcp.f32 %v1151_v5  ;;  %vm1197_vm12 = vmor %vm1195_vm11, %vm1196_vm10  ;;  %v1214_v27 = vand.u32 2147483647, %v1151_v5  ;;  %vm1210_vm15 = vweird.f32 %v1151_v5 }
 0x341   :  { %v1189_v9 = vmul.f32 %v2104_v2, %v1188_v8  ;;  %v1192_v10 = vsub.f32 1.0, %v1191_v53  ;;  %v1216_v2 = vand.u32 2147483648, %v1151_v5 }
 0x342   :  { %vm1215_vm1 = vcmp.eq.f32.partialorder %v1214_v27, 8.507059e+37 }
 0x343   :  { %1281 = vst [vmem:[#allocation10 + $0x8] sm:$0xff] %v1189_v9  ;;  %v1193_v13 = vmul.f32 %v1829_v3, %v1192_v10  ;;  %v1217_v32 = vor.u32 1.1754944e-38, %v1216_v2 }
 0x345   :  { %v1194_v17 = vadd.f32 %v1829_v3, %v1193_v13 }
 0x346   :  { %v1831_v19 = vpop.eup %1830 }
 0x347   :  { %v1198_v14 = vsel %vm1197_vm12, %v1829_v3, %v1194_v17  ;;  %v1206_v22 = vmul.f32 %v1831_v19, %v1151_v5  ;;  %v1153_v23 = vpop.xlane.xlu0 %1152  ;;  %vm1211_vm14 = vweird.f32 %v1831_v19 }
 0x348   :  { %v1203_v25 = vsel %vm1200_vm13, %v1202_v21, %v1198_v14  ;;  %1832 = vrcp.f32 %v1153_v23  ;;  %vm1212_vm0 = vmor %vm1210_vm15, %vm1211_vm14  ;;  %v1231_v16 = vand.u32 2147483648, %v1153_v23  ;;  %v1229_v42 = vand.u32 2147483647, %v1153_v23 }
 0x349   :  { %v1204_v26 = vmul.f32 %v2107_v30, %v1203_v25  ;;  %v1207_v6 = vsub.f32 1.0, %v1206_v22  ;;  %vm1225_vm3 = vweird.f32 %v1153_v23 }
 0x34a   :  { %v1232_v46 = vor.u32 1.1754944e-38, %v1231_v16  ;;  %vm1230_vm5 = vcmp.eq.f32.partialorder %v1229_v42, 8.507059e+37 }
 0x34b   :  { %1282 = vst [vmem:[#allocation10 + $0x10] sm:$0xff] %v1204_v26  ;;  %v1208_v55 = vmul.f32 %v1831_v19, %v1207_v6 }
 0x34d   :  { %v1209_v29 = vadd.f32 %v1831_v19, %v1208_v55 }
 0x34e   :  { %v1833_v31 = vpop.eup %1832 }
 0x34f   :  { %v1213_v12 = vsel %vm1212_vm0, %v1831_v19, %v1209_v29  ;;  %v1221_v24 = vmul.f32 %v1833_v31, %v1153_v23  ;;  %v1155_v33 = vpop.xlane.xlu1 %1154  ;;  %vm1226_vm2 = vweird.f32 %v1833_v31 }
 0x350   :  { %v1218_v20 = vsel %vm1215_vm1, %v1217_v32, %v1213_v12  ;;  %1834 = vrcp.f32 %v1155_v33  ;;  %vm1227_vm4 = vmor %vm1225_vm3, %vm1226_vm2  ;;  %v1246_v50 = vand.u32 2147483648, %v1155_v33  ;;  %v1244_v36 = vand.u32 2147483647, %v1155_v33 }
 0x351   :  { %v1219_v37 = vmul.f32 %v2110_v7, %v1218_v20  ;;  %v1222_v30 = vsub.f32 1.0, %v1221_v24  ;;  %vm1240_vm7 = vweird.f32 %v1155_v33 }
 0x352   :  { %v1247_v57 = vor.u32 1.1754944e-38, %v1246_v50  ;;  %vm1245_vm9 = vcmp.eq.f32.partialorder %v1244_v36, 8.507059e+37 }
 0x353   :  { %1283 = vst [vmem:[#allocation10 + $0x18] sm:$0xff] %v1219_v37  ;;  %v1223_v39 = vmul.f32 %v1833_v31, %v1222_v30 }
 0x355   :  { %v1224_v43 = vadd.f32 %v1833_v31, %v1223_v39 }
 0x356   :  { %v1835_v38 = vpop.eup %1834 }
 0x357   :  { %v1228_v48 = vsel %vm1227_vm4, %v1833_v31, %v1224_v43  ;;  %v1236_v28 = vmul.f32 %v1835_v38, %v1155_v33  ;;  %v1157_v18 = vpop.xlane.xlu2 %1156  ;;  %vm1241_vm6 = vweird.f32 %v1835_v38 }
 0x358   :  { %v1233_v35 = vsel %vm1230_vm5, %v1232_v46, %v1228_v48  ;;  %1836 = vrcp.f32 %v1157_v18  ;;  %vm1242_vm8 = vmor %vm1240_vm7, %vm1241_vm6  ;;  %v1261_v63 = vand.u32 2147483648, %v1157_v18  ;;  %v1259_v45 = vand.u32 2147483647, %v1157_v18 }
 0x359   :  { %v1234_v49 = vmul.f32 %v2113_v34, %v1233_v35  ;;  %v1237_v7 = vsub.f32 1.0, %v1236_v28  ;;  %vm1255_vm11 = vweird.f32 %v1157_v18 }
 0x35a   :  { %v1262_v3 = vor.u32 1.1754944e-38, %v1261_v63  ;;  %vm1260_vm13 = vcmp.eq.f32.partialorder %v1259_v45, 8.507059e+37 }
 0x35b   :  { %1284 = vst [vmem:[#allocation10 + $0x20] sm:$0xff] %v1234_v49  ;;  %v1238_v52 = vmul.f32 %v1835_v38, %v1237_v7 }
 0x35d   :  { %v1239_v54 = vadd.f32 %v1835_v38, %v1238_v52 }
 0x35e   :  { %v1837_v56 = vpop.eup %1836 }
 0x35f   :  { %v1243_v58 = vsel %vm1242_vm8, %v1835_v38, %v1239_v54  ;;  %v1251_v59 = vmul.f32 %v1837_v56, %v1157_v18  ;;  %v1159_v60 = vpop.xlane.xlu0 %1158  ;;  %vm1256_vm10 = vweird.f32 %v1837_v56 }
 0x360   :  { %v1248_v61 = vsel %vm1245_vm9, %v1247_v57, %v1243_v58  ;;  %1838 = vrcp.f32 %v1159_v60  ;;  %vm1257_vm12 = vmor %vm1255_vm11, %vm1256_vm10  ;;  %v1276_v9 = vand.u32 2147483648, %v1159_v60  ;;  %v1274_v10 = vand.u32 2147483647, %v1159_v60 }
 0x361   :  { %v1249_v62 = vmul.f32 %v2116_v40, %v1248_v61  ;;  %v1252_v34 = vsub.f32 1.0, %v1251_v59  ;;  %vm1270_vm15 = vweird.f32 %v1159_v60 }
 0x362   :  { %v1277_v13 = vor.u32 1.1754944e-38, %v1276_v9  ;;  %vm1275_vm1 = vcmp.eq.f32.partialorder %v1274_v10, 8.507059e+37 }
 0x363   :  { %1285 = vst [vmem:[#allocation10 + $0x28] sm:$0xff] %v1249_v62  ;;  %v1253_v41 = vmul.f32 %v1837_v56, %v1252_v34 }
 0x365   :  { %v1254_v0 = vadd.f32 %v1837_v56, %v1253_v41 }
 0x366   :  { %v1839_v1 = vpop.eup %1838 }
 0x367   :  { %v1258_v4 = vsel %vm1257_vm12, %v1837_v56, %v1254_v0  ;;  %v1266_v51 = vmul.f32 %v1839_v1, %v1159_v60  ;;  %vm1271_vm14 = vweird.f32 %v1839_v1 }
 0x368   :  { %v1263_v53 = vsel %vm1260_vm13, %v1262_v3, %v1258_v4  ;;  %vm1272_vm0 = vmor %vm1270_vm15, %vm1271_vm14 }
 0x369   :  { %v1264_v5 = vmul.f32 %v2119_v44, %v1263_v53  ;;  %v1267_v8 = vsub.f32 1.0, %v1266_v51 }
 0x36b   :  { %1286 = vst [vmem:[#allocation10 + $0x30] sm:$0xff] %v1264_v5  ;;  %v1268_v40 = vmul.f32 %v1839_v1, %v1267_v8 }
 0x36d   :  { %v1269_v11 = vadd.f32 %v1839_v1, %v1268_v40 }
 0x36f   :  { %v1273_v15 = vsel %vm1272_vm0, %v1839_v1, %v1269_v11 }
 0x370   :  { %v1278_v17 = vsel %vm1275_vm1, %v1277_v13, %v1273_v15 }
 0x371   :  { %v1279_v44 = vmul.f32 %v2122_v47, %v1278_v17 }
 0x373   :  { %1287 = vst [vmem:[#allocation10 + $0x38] sm:$0xff] %v1279_v44 }
 0x374   :  { %1300 = dma.vmem_to_hbm [thread:$0]  %s1293_s25, 1024, %s1295_s28, [#allocation4], %s1977_s29, %s1977_s29, %s1978_s30  }
 0x375   :  { %1966 = dma.done.wait [#allocation4], 1024  }
 0x376   :  { %1967 = vsyncadd [#allocation4], 4294966272 }
 0x377   :  { %1305 = vsyncpa [#allocation3], 1 }
 0x378   :  { %1306 = vsyncpa [#allocation6], 1 }
 0x379   :  { %1307 = vsyncpa [#allocation9], 1 }
 0x37a   :  { %1308 = vsyncpa [#allocation4], 1 }

</bundles_post_ra>
